<compile_context>
chip_gen: v6e
topology: v6e:2x2x1
jax: 0.10.0
libtpu: 0.0.40
codegen_flags: <defaults>
</compile_context>

<pallas_src>
import jax
import jax.numpy as jnp
from jax.experimental import pallas as pl
from jax.experimental.pallas import tpu as pltpu

# ----------------------------- hyper-parameters -----------------------------
NET_WIDTH    = 32    # args.net_width           (Deformation.W)
DEFOR_DEPTH  = 2     # args.defor_depth         (Deformation.D)  -> D-1 hidden WxW layers
POSBASE_PE   = 2     # args.posebase_pe
SCALE_ROT_PE = 2     # args.scale_rotation_pe
PACK_W       = 16    # packed feature width of the fused input/output slab
MAX_TILE_N   = 4096  # cap on columns per grid step (multiple of 256)

HEAD_OUT = (3, 3, 4, 1)  # pos_deform, scales_deform, rotations_deform, opacity_deform

# Packed slab ROW layout (feature-major, shared by input base and output):
#   [0:3]  point xyz   [3:6] scales   [6:10] rotations   [10] opacity
#   [11]   time (input only)  [12] ones (bias fold, input only)  [13:16] zero pad


# ------------------------------- poc_fre (glue) ------------------------------
def poc_fre(x, poc):
    emb = (x[..., None] * poc).reshape(x.shape[:-1] + (-1,))
    return jnp.concatenate([x, jnp.sin(emb), jnp.cos(emb)], axis=-1)


# --------------------------------- the kernel --------------------------------
def _deform_kernel(x_ref,                       # (16, TILE_N) packed base (+time, +ones)
                   w0t_ref,                     # (W, 16)        first layer, bias folded
                   wht_ref, bh_ref,             # (D-1, W, W), (D-1, W, 1) hidden layers
                   wcat1t_ref, bcat1_ref,       # (4W, W), (4W, 1)  fused head layer 1
                   w2t_ref, b2_ref,             # (16, 4W), (16, 1) block-diag head layer 2
                   out_ref):                    # (16, TILE_N) packed outputs
    x = x_ref[...]

    # feature_out: Linear(4, W) (bias folded via the ones row) then (D-1)x[ReLU, Linear]
    h = jnp.dot(w0t_ref[...], x, preferred_element_type=jnp.float32)
    for i in range(DEFOR_DEPTH - 1):
        h = jnp.dot(wht_ref[i], jnp.maximum(h, 0.0),
                    preferred_element_type=jnp.float32) + bh_ref[i]

    # fused heads: ReLU -> Linear(W, 4W) -> ReLU -> block-diagonal Linear(4W, 16)
    g = jnp.dot(wcat1t_ref[...], jnp.maximum(h, 0.0),
                preferred_element_type=jnp.float32) + bcat1_ref[...]
    delta = jnp.dot(w2t_ref[...], jnp.maximum(g, 0.0),
                    preferred_element_type=jnp.float32) + b2_ref[...]

    # mask == 1 on this config path, so output = base + delta (lane-dense store).
    out_ref[...] = x + delta


# --------------------------------- wrapper -----------------------------------
def _round_up(a, b):
    return -(-a // b) * b


def _choose_tile(n):
    # >= 2 tiles so both v7x TensorCores get work; multiple of 256; capped for VMEM.
    tile = _round_up(pl.cdiv(n, 2), 256)
    return max(256, min(MAX_TILE_N, tile))


def deform_network_forward(params, point, scales, rotations, opacity, times_sel,
                           pos_poc=None, rs_poc=None):
    # NOTE: only the identity slices of the poc_fre embeddings reach the outputs on
    # this path, so the sin/cos embedding work is skipped (pos_poc/rs_poc unused).
    N = point.shape[0]
    W = NET_WIDTH

    tile_n = _choose_tile(N)
    n_tiles = pl.cdiv(N, tile_n)
    n_pad = n_tiles * tile_n

    # --- pack the inputs into one feature-major (16, N_pad) slab ---
    x16t = jnp.concatenate(
        [point.T, scales.T, rotations.T, opacity.T, times_sel.T,
         jnp.ones((1, N), jnp.float32),                  # bias-fold row (index 12)
         jnp.zeros((PACK_W - 13, N), jnp.float32)], axis=0)
    if n_pad != N:
        x16t = jnp.pad(x16t, ((0, 0), (0, n_pad - N)))

    # --- pack / pre-transpose weights once (outside the kernel) ---
    w0t = jnp.zeros((W, PACK_W), jnp.float32)
    w0t = w0t.at[:, 0:3].set(params["w0"][0:3].T)        # xyz rows of original w0
    w0t = w0t.at[:, 11].set(params["w0"][3])             # time row
    w0t = w0t.at[:, 12].set(params["b0"][0])             # bias folded via ones row

    wht = jnp.transpose(params["wh"], (0, 2, 1))          # (D-1, W, W) each transposed
    bh_col = params["bh"][:, :, None]                     # (D-1, W, 1)

    wcat1t = jnp.transpose(params["whead1"], (0, 2, 1)).reshape(4 * W, W)
    bcat1_col = params["bhead1"].reshape(4 * W, 1)

    w2t = jnp.zeros((PACK_W, 4 * W), jnp.float32)
    w2t = w2t.at[0:3,   0 * W:1 * W].set(params["w2_pos"].T)
    w2t = w2t.at[3:6,   1 * W:2 * W].set(params["w2_scl"].T)
    w2t = w2t.at[6:10,  2 * W:3 * W].set(params["w2_rot"].T)
    w2t = w2t.at[10:11, 3 * W:4 * W].set(params["w2_opa"].T)

    b2_col = jnp.zeros((PACK_W, 1), jnp.float32)
    b2_col = b2_col.at[0:3, 0].set(params["b2_pos"][0])
    b2_col = b2_col.at[3:6, 0].set(params["b2_scl"][0])
    b2_col = b2_col.at[6:10, 0].set(params["b2_rot"][0])
    b2_col = b2_col.at[10:11, 0].set(params["b2_opa"][0])

    col_spec = pl.BlockSpec((PACK_W, tile_n), lambda i: (0, i))

    def full2(shape):
        return pl.BlockSpec(shape, lambda i: (0, 0))

    def full3(shape):
        return pl.BlockSpec(shape, lambda i: (0, 0, 0))

    in_specs = [
        col_spec,
        full2(w0t.shape),
        full3(wht.shape), full3(bh_col.shape),
        full2(wcat1t.shape), full2(bcat1_col.shape),
        full2(w2t.shape), full2(b2_col.shape),
    ]

    # 2 * (16*W + (D-1)*W*W + W*4W + 4W*16) MACs per column
    flops_per_col = 2 * (PACK_W * W + (DEFOR_DEPTH - 1) * W * W + W * 4 * W + 4 * W * PACK_W)
    cost = pl.CostEstimate(
        flops=flops_per_col * n_pad,
        transcendentals=0,
        bytes_accessed=2 * PACK_W * 4 * n_pad + 4 * (4 * W * W + 4 * W * PACK_W))

    out = pl.pallas_call(
        _deform_kernel,
        grid=(n_tiles,),
        in_specs=in_specs,
        out_specs=col_spec,
        out_shape=jax.ShapeDtypeStruct((PACK_W, n_pad), jnp.float32),
        compiler_params=pltpu.CompilerParams(dimension_semantics=("parallel",)),
        cost_estimate=cost,
    )(x16t, w0t, wht, bh_col, wcat1t, bcat1_col, w2t, b2_col)

    pts = out[0:3, :N].T
    scl = out[3:6, :N].T
    rot = out[6:10, :N].T
    opa = out[10:11, :N].T
    shs = None
    return pts, scl, rot, opa, shs


# ----------------------------- pure-JAX reference ----------------------------
def reference_forward(params, point, scales, rotations, opacity, times_sel,
                      pos_poc, rs_poc):
    point_emb = poc_fre(point, pos_poc)
    scales_emb = poc_fre(scales, rs_poc)
    rotations_emb = poc_fre(rotations, rs_poc)
    x = jnp.concatenate([point_emb[:, :3], times_sel[:, :1]], axis=-1)

    h = x @ params["w0"] + params["b0"]
    for i in range(DEFOR_DEPTH - 1):
        h = jnp.maximum(h, 0.0) @ params["wh"][i] + params["bh"][i]

    def head(k, w2, b2):
        g = jnp.maximum(h, 0.0) @ params["whead1"][k] + params["bhead1"][k]
        return jnp.maximum(g, 0.0) @ w2 + b2

    dx = head(0, params["w2_pos"], params["b2_pos"])
    ds = head(1, params["w2_scl"], params["b2_scl"])
    dr = head(2, params["w2_rot"], params["b2_rot"])
    do = head(3, params["w2_opa"], params["b2_opa"])

    mask = jnp.ones_like(opacity[:, :1])
    pts = point_emb[:, :3] * mask + dx
    scl = scales_emb[:, :3] * mask + ds
    rot = rotations_emb[:, :4] + dr
    opa = opacity[:, :1] * mask + do
    return pts, scl, rot, opa, None


# ----------------------------- deterministic init ----------------------------
def _xavier(key, shape):
    fan_in, fan_out = shape[-2], shape[-1]
    lim = (6.0 / (fan_in + fan_out)) ** 0.5
    return jax.random.uniform(key, shape, jnp.float32, -lim, lim)


def _bias(key, fan_in, out):
    lim = 1.0 / (fan_in ** 0.5)
    return jax.random.uniform(key, (1, out), jnp.float32, -lim, lim)


def make_params(key):
    W = NET_WIDTH
    keys = jax.random.split(key, 32)
    p = {
        "w0": _xavier(keys[0], (4, W)),
        "b0": _bias(keys[1], 4, W),
        "wh": _xavier(keys[2], (max(DEFOR_DEPTH - 1, 1), W, W))[: DEFOR_DEPTH - 1],
        "bh": jax.random.uniform(keys[3], (max(DEFOR_DEPTH - 1, 1), W), jnp.float32,
                                 -1.0 / W ** 0.5, 1.0 / W ** 0.5)[: DEFOR_DEPTH - 1],
        "whead1": _xavier(keys[4], (4, W, W)),
        "bhead1": jax.random.uniform(keys[5], (4, W), jnp.float32,
                                     -1.0 / W ** 0.5, 1.0 / W ** 0.5),
    }
    names = ["pos", "scl", "rot", "opa"]
    for i, (name, out) in enumerate(zip(names, HEAD_OUT)):
        p[f"w2_{name}"] = _xavier(keys[6 + 2 * i], (W, out))
        p[f"b2_{name}"] = _bias(keys[7 + 2 * i], W, out)
    return p


# ------------------------------------ main ------------------------------------
if __name__ == "__main__":
    key = jax.random.PRNGKey(0)
    k_param, k_pt, k_sc, k_rt, k_op, k_t = jax.random.split(key, 6)

    N = 1000  # arbitrary (not a multiple of the tile) -> exercises tail padding
    point = jax.random.normal(k_pt, (N, 3), jnp.float32)
    scales = jax.random.normal(k_sc, (N, 3), jnp.float32)
    rotations = jax.random.normal(k_rt, (N, 4), jnp.float32)
    opacity = jax.random.uniform(k_op, (N, 1), jnp.float32)
    times_sel = jax.random.uniform(k_t, (N, 1), jnp.float32)

    pos_poc = jnp.float32(2.0) ** jnp.arange(POSBASE_PE, dtype=jnp.float32)
    rs_poc = jnp.float32(2.0) ** jnp.arange(SCALE_ROT_PE, dtype=jnp.float32)

    params = make_params(k_param)

    pts, scl, rot, opa, shs = deform_network_forward(
        params, point, scales, rotations, opacity, times_sel, pos_poc, rs_poc)
    jax.block_until_ready((pts, scl, rot, opa))

    r_pts, r_scl, r_rot, r_opa, _ = reference_forward(
        params, point, scales, rotations, opacity, times_sel, pos_poc, rs_poc)

    assert shs is None
    assert jnp.allclose(pts, r_pts, atol=1e-5, rtol=1e-5)
    assert jnp.allclose(scl, r_scl, atol=1e-5, rtol=1e-5)
    assert jnp.allclose(rot, r_rot, atol=1e-5, rtol=1e-5)
    assert jnp.allclose(opa, r_opa, atol=1e-5, rtol=1e-5)

    print("KERNEL_OK")
</pallas_src>

<mosaic_0001>
module attributes {stable_mosaic.version = 11 : i64} {
  func.func @_deform_kernel(%arg0: i32, %arg1: memref<16x512xf32, #tpu.memory_space<vmem>>, %arg2: memref<32x16xf32, #tpu.memory_space<vmem>>, %arg3: memref<1x32x32xf32, #tpu.memory_space<vmem>>, %arg4: memref<1x32x1xf32, #tpu.memory_space<vmem>>, %arg5: memref<128x32xf32, #tpu.memory_space<vmem>>, %arg6: memref<128x1xf32, #tpu.memory_space<vmem>>, %arg7: memref<16x128xf32, #tpu.memory_space<vmem>>, %arg8: memref<16x1xf32, #tpu.memory_space<vmem>>, %arg9: memref<16x512xf32, #tpu.memory_space<vmem>>) attributes {dimension_semantics = [#tpu.dimension_semantics<parallel>], iteration_bounds = array<i64: 2>, scalar_prefetch = 0 : i64, scratch_operands = 0 : i64, tpu.core_type = #tpu.core_type<tc>, window_params = [{transform_indices = @transform_0, window_bounds = array<i64: 16, 512>}, {pipeline_mode = #tpu.pipeline_mode<synchronous>, transform_indices = @transform_1, window_bounds = array<i64: 32, 16>}, {pipeline_mode = #tpu.pipeline_mode<synchronous>, transform_indices = @transform_2, window_bounds = array<i64: 1, 32, 32>}, {pipeline_mode = #tpu.pipeline_mode<synchronous>, transform_indices = @transform_3, window_bounds = array<i64: 1, 32, 1>}, {pipeline_mode = #tpu.pipeline_mode<synchronous>, transform_indices = @transform_4, window_bounds = array<i64: 128, 32>}, {pipeline_mode = #tpu.pipeline_mode<synchronous>, transform_indices = @transform_5, window_bounds = array<i64: 128, 1>}, {pipeline_mode = #tpu.pipeline_mode<synchronous>, transform_indices = @transform_6, window_bounds = array<i64: 16, 128>}, {pipeline_mode = #tpu.pipeline_mode<synchronous>, transform_indices = @transform_7, window_bounds = array<i64: 16, 1>}, {transform_indices = @transform_8, window_bounds = array<i64: 16, 512>}]} {
    %c0 = arith.constant 0 : index
    %c0_0 = arith.constant 0 : index
    %0 = vector.load %arg1[%c0, %c0_0] : memref<16x512xf32, #tpu.memory_space<vmem>>, vector<16x512xf32>
    %c0_1 = arith.constant 0 : index
    %c0_2 = arith.constant 0 : index
    %1 = vector.load %arg2[%c0_1, %c0_2] : memref<32x16xf32, #tpu.memory_space<vmem>>, vector<32x16xf32>
    %cst = arith.constant dense<0.000000e+00> : vector<32x512xf32>
    %2 = tpu.matmul %1, %0, %cst {dimension_numbers = #tpu.dot_dimension_numbers<[1], [0], [0], [1], [0, 0, 1, 1], [], []>} : vector<32x16xf32>, vector<16x512xf32>, vector<32x512xf32> -> vector<32x512xf32>
    %c0_3 = arith.constant 0 : index
    %c0_4 = arith.constant 0 : index
    %c0_5 = arith.constant 0 : index
    %3 = vector.load %arg3[%c0_3, %c0_4, %c0_5] : memref<1x32x32xf32, #tpu.memory_space<vmem>>, vector<1x32x32xf32>
    %4 = vector.shape_cast %3 : vector<1x32x32xf32> to vector<32x32xf32>
    %cst_6 = arith.constant 0.000000e+00 : f32
    %5 = vector.broadcast %cst_6 : f32 to vector<32x512xf32>
    %6 = arith.maximumf %2, %5 : vector<32x512xf32>
    %cst_7 = arith.constant dense<0.000000e+00> : vector<32x512xf32>
    %7 = tpu.matmul %4, %6, %cst_7 {dimension_numbers = #tpu.dot_dimension_numbers<[1], [0], [0], [1], [0, 0, 1, 1], [], []>} : vector<32x32xf32>, vector<32x512xf32>, vector<32x512xf32> -> vector<32x512xf32>
    %c0_8 = arith.constant 0 : index
    %c0_9 = arith.constant 0 : index
    %c0_10 = arith.constant 0 : index
    %8 = vector.load %arg4[%c0_8, %c0_9, %c0_10] : memref<1x32x1xf32, #tpu.memory_space<vmem>>, vector<1x32x1xf32>
    %9 = vector.shape_cast %8 : vector<1x32x1xf32> to vector<32x1xf32>
    %10 = vector.broadcast %9 : vector<32x1xf32> to vector<32x512xf32>
    %11 = arith.addf %7, %10 : vector<32x512xf32>
    %c0_11 = arith.constant 0 : index
    %c0_12 = arith.constant 0 : index
    %12 = vector.load %arg5[%c0_11, %c0_12] : memref<128x32xf32, #tpu.memory_space<vmem>>, vector<128x32xf32>
    %cst_13 = arith.constant 0.000000e+00 : f32
    %13 = vector.broadcast %cst_13 : f32 to vector<32x512xf32>
    %14 = arith.maximumf %11, %13 : vector<32x512xf32>
    %cst_14 = arith.constant dense<0.000000e+00> : vector<128x512xf32>
    %15 = tpu.matmul %12, %14, %cst_14 {dimension_numbers = #tpu.dot_dimension_numbers<[1], [0], [0], [1], [0, 0, 1, 1], [], []>} : vector<128x32xf32>, vector<32x512xf32>, vector<128x512xf32> -> vector<128x512xf32>
    %c0_15 = arith.constant 0 : index
    %c0_16 = arith.constant 0 : index
    %16 = vector.load %arg6[%c0_15, %c0_16] : memref<128x1xf32, #tpu.memory_space<vmem>>, vector<128x1xf32>
    %17 = vector.broadcast %16 : vector<128x1xf32> to vector<128x512xf32>
    %18 = arith.addf %15, %17 : vector<128x512xf32>
    %c0_17 = arith.constant 0 : index
    %c0_18 = arith.constant 0 : index
    %19 = vector.load %arg7[%c0_17, %c0_18] : memref<16x128xf32, #tpu.memory_space<vmem>>, vector<16x128xf32>
    %cst_19 = arith.constant 0.000000e+00 : f32
    %20 = vector.broadcast %cst_19 : f32 to vector<128x512xf32>
    %21 = arith.maximumf %18, %20 : vector<128x512xf32>
    %cst_20 = arith.constant dense<0.000000e+00> : vector<16x512xf32>
    %22 = tpu.matmul %19, %21, %cst_20 {dimension_numbers = #tpu.dot_dimension_numbers<[1], [0], [0], [1], [0, 0, 1, 1], [], []>} : vector<16x128xf32>, vector<128x512xf32>, vector<16x512xf32> -> vector<16x512xf32>
    %c0_21 = arith.constant 0 : index
    %c0_22 = arith.constant 0 : index
    %23 = vector.load %arg8[%c0_21, %c0_22] : memref<16x1xf32, #tpu.memory_space<vmem>>, vector<16x1xf32>
    %24 = vector.broadcast %23 : vector<16x1xf32> to vector<16x512xf32>
    %25 = arith.addf %22, %24 : vector<16x512xf32>
    %26 = arith.addf %0, %25 : vector<16x512xf32>
    %c0_23 = arith.constant 0 : index
    %c0_24 = arith.constant 0 : index
    %27 = vector.load %arg9[%c0_23, %c0_24] : memref<16x512xf32, #tpu.memory_space<vmem>>, vector<16x512xf32>
    tpu.vector_store %arg9[%c0_23, %c0_24], %26 {strides = array<i32>} : memref<16x512xf32, #tpu.memory_space<vmem>>, vector<16x512xf32>,
    return
  }
  func.func @transform_0(%arg0: i32) -> (i32, i32) {
    %c0_i32 = arith.constant 0 : i32
    %c0_i32_0 = arith.constant 0 : i32
    return %c0_i32, %arg0 : i32, i32
  }
  func.func @transform_1(%arg0: i32) -> (i32, i32) {
    %c0_i32 = arith.constant 0 : i32
    %c0_i32_0 = arith.constant 0 : i32
    %c0_i32_1 = arith.constant 0 : i32
    return %c0_i32, %c0_i32_0 : i32, i32
  }
  func.func @transform_2(%arg0: i32) -> (i32, i32, i32) {
    %c0_i32 = arith.constant 0 : i32
    %c0_i32_0 = arith.constant 0 : i32
    %c0_i32_1 = arith.constant 0 : i32
    %c0_i32_2 = arith.constant 0 : i32
    return %c0_i32, %c0_i32_0, %c0_i32_1 : i32, i32, i32
  }
  func.func @transform_3(%arg0: i32) -> (i32, i32, i32) {
    %c0_i32 = arith.constant 0 : i32
    %c0_i32_0 = arith.constant 0 : i32
    %c0_i32_1 = arith.constant 0 : i32
    %c0_i32_2 = arith.constant 0 : i32
    return %c0_i32, %c0_i32_0, %c0_i32_1 : i32, i32, i32
  }
  func.func @transform_4(%arg0: i32) -> (i32, i32) {
    %c0_i32 = arith.constant 0 : i32
    %c0_i32_0 = arith.constant 0 : i32
    %c0_i32_1 = arith.constant 0 : i32
    return %c0_i32, %c0_i32_0 : i32, i32
  }
  func.func @transform_5(%arg0: i32) -> (i32, i32) {
    %c0_i32 = arith.constant 0 : i32
    %c0_i32_0 = arith.constant 0 : i32
    %c0_i32_1 = arith.constant 0 : i32
    return %c0_i32, %c0_i32_0 : i32, i32
  }
  func.func @transform_6(%arg0: i32) -> (i32, i32) {
    %c0_i32 = arith.constant 0 : i32
    %c0_i32_0 = arith.constant 0 : i32
    %c0_i32_1 = arith.constant 0 : i32
    return %c0_i32, %c0_i32_0 : i32, i32
  }
  func.func @transform_7(%arg0: i32) -> (i32, i32) {
    %c0_i32 = arith.constant 0 : i32
    %c0_i32_0 = arith.constant 0 : i32
    %c0_i32_1 = arith.constant 0 : i32
    return %c0_i32, %c0_i32_0 : i32, i32
  }
  func.func @transform_8(%arg0: i32) -> (i32, i32) {
    %c0_i32 = arith.constant 0 : i32
    %c0_i32_0 = arith.constant 0 : i32
    return %c0_i32, %arg0 : i32, i32
  }
}

</mosaic_0001>

<bundles_post_ra>
// kernel: tpu_custom_call.1
= control target key start
LH: loop header
LB: loop body
LE: loop exit
PB: predicated region body
PF: predicated region fallthrough
CT: control target
= control target key end

     0   :  { %13 = vsyncpa [#allocation4], 0  ;;  %s2369_s0 = inlined_call_operand.vmem [shape: f32[16,1024], index: 0, kind: input, shape index: {}]   ;;  %s2370_s1 = inlined_call_operand.vmem [shape: f32[32,16], index: 1, kind: input, shape index: {}]   ;;  %s2371_s2 = inlined_call_operand.vmem [shape: f32[1,32,32], index: 2, kind: input, shape index: {}]   ;;  %s2372_s3 = inlined_call_operand.vmem [shape: f32[1,32,1], index: 3, kind: input, shape index: {}]   ;;  %s2373_s4 = inlined_call_operand.vmem [shape: f32[128,32], index: 4, kind: input, shape index: {}]   ;;  %s2374_s5 = inlined_call_operand.vmem [shape: f32[128,1], index: 5, kind: input, shape index: {}]   ;;  %s2375_s6 = inlined_call_operand.vmem [shape: f32[16,128], index: 6, kind: input, shape index: {}]   ;;  %s2376_s7 = inlined_call_operand.vmem [shape: f32[16,1], index: 7, kind: input, shape index: {}]   ;;  %s2377_s8 = inlined_call_operand.hbm [shape: f32[16,1024], index: 8, kind: output, shape index: {}]  }
   0x1   :  { %15 = vsyncpa [#allocation4 + $0x1], 0  ;;  %s1837_s27 = smov 0   ;;  %s1839_s28 = smov 0  }
   0x2   :  { %s1841_s29 = smov 0   ;;  %s1843_s30 = smov 0  }
   0x3 LB: > { %s1605_s9 = sadd.s32 4294967295, %s1784_s30   ;;  %s1606_s10 = sadd.s32 4294967294, %s1784_s30   ;;  %s1784_s30 = sphi %s1843_s30, %s2436_s30   ;;  %s1780_s29 = sphi %s1841_s29, %s2435_s29   ;;  %s1776_s28 = sphi %s1839_s28, %s2434_s28   ;;  %s1772_s27 = sphi %s1837_s27, %s2433_s27  }
   0x4   : > { %s1860_s11 = sadd.s32 1, %s1784_s30   ;;  %s28_s12 = sadd.s32 1, %s1780_s29 }
   0x5   : > { %s25_s13 = ssub.s32 %s1784_s30, %s1860_s11  ;;  %p35_p0 = scmp.ne.s32.totalorder %s1780_s29, %s1776_s28 }
   0x6   : > { %p26_p1 = scmp.eq.s32.totalorder %s25_s13, 0  ;;  %p36_p2 = scmp.eq.s32.totalorder %s1784_s30, 0 }
   0x7   : > { %p212_p3 = scmp.eq.s32.totalorder %s1605_s9, 1  ;;  %p217_p4 = scmp.ne.s32.totalorder %s1776_s28, %s1772_s27 }
   0x8   : > { %s1873_s14 = scalar_select %p26_p1, %s1780_s29, %s28_s12  }
   0x9   : > { %p37_p5 = por %p36_p2, %p35_p0  ;;  %p1875_p6 = por %p212_p3, %p35_p0 }
   0xa   : > { %p218_p7 = scmp.eq.s32.totalorder %s1606_s10, 1  ;;  %p1608_p9 = scmp.ge.s32.totalorder %s1784_s30, 2 }
   0xc   : > { %p1879_p8 = por %p218_p7, %p217_p4  ;;  %255 = sbr.rel (%p1608_p9) target bundleno = 25 (0x19), region = 44 }
  0x11   : > { %258 = sbr.rel (!%p37_p5) target bundleno = 25 (0x19), region = 48  ;;  %s260_s17 = sand.u32 (%p37_p5), 1, %s1780_s29  }
  0x12   : > { %s1668_s18 = sshll.u32 (%p37_p5), %s1784_s30, 5  ;;  %s1609_s19 = sshll.u32 (%p37_p5), %s260_s17, 6 }
  0x13   : > { %s265_s22 = scalar_lea.vmem (%p37_p5), %s2369_s0, %s1668_s18  ;;  %s262_s23 = scalar_lea.vmem (%p37_p5), [#allocation2], %s1609_s19 }
  0x14   : > { %v278_v0 = vld [vmem:[%s265_s22] sm:$0xff] (%p37_p5)  ;;  %v280_v1 = vld [vmem:[%s265_s22 + $0x8] sm:$0xff] (%p37_p5)  ;;  %v282_v2 = vld [vmem:[%s265_s22 + $0x10] sm:$0xff] (%p37_p5) }
  0x15   : > { %279 = vst [vmem:[%s262_s23] sm:$0xff] (%p37_p5), %v278_v0  ;;  %281 = vst [vmem:[%s262_s23 + $0x8] sm:$0xff] (%p37_p5), %v280_v1  ;;  %v284_v3 = vld [vmem:[%s265_s22 + $0x18] sm:$0xff] (%p37_p5)  ;;  %v286_v4 = vld [vmem:[%s265_s22 + $0x40] sm:$0xff] (%p37_p5) }
  0x16   : > { %283 = vst [vmem:[%s262_s23 + $0x10] sm:$0xff] %v282_v2  ;;  %v288_v5 = vld [vmem:[%s265_s22 + $0x48] sm:$0xff]  ;;  %285 = vst [vmem:[%s262_s23 + $0x18] sm:$0xff] %v284_v3  ;;  %v290_v6 = vld [vmem:[%s265_s22 + $0x50] sm:$0xff] }
  0x17   : > { %287 = vst [vmem:[%s262_s23 + $0x20] sm:$0xff] %v286_v4  ;;  %289 = vst [vmem:[%s262_s23 + $0x28] sm:$0xff] %v288_v5  ;;  %v292_v7 = vld [vmem:[%s265_s22 + $0x58] sm:$0xff] }
  0x18   : > { %291 = vst [vmem:[%s262_s23 + $0x30] sm:$0xff] %v290_v6  ;;  %293 = vst [vmem:[%s262_s23 + $0x38] sm:$0xff] %v292_v7 }
  0x19 PF: > { %p1612_p10 = scmp.ge.s32.totalorder %s1784_s30, 1  ;;  %p298_p11 = scmp.lt.s32.totalorder %s1784_s30, 3 }
  0x1b   : > { %p299_p12 = pnand %p1612_p10, %p298_p11 }
  0x1d   : > { %302 = sbr.rel (%p299_p12) target bundleno = 987 (0x3db), region = 71 }
  0x22   : > { %s305_s24 = sand.u32 1, %s1776_s28   ;;  %v2378_v8 = vmov 0.0   ;;  %v348_v17 = vld [vmem:[%s2370_s1] sm:$0xff]  ;;  %vm352_vm0 = vcmask 130048   ;;  %v349_v18 = vld [vmem:[%s2370_s1 + $0x8] sm:$0xff]  ;;  %v350_v19 = vld [vmem:[%s2370_s1 + $0x10] sm:$0xff] }
  0x23   : > { %s1896_s25 = sshll.u32 %s305_s24, 6  ;;  %429 = vmatprep.mubr.f32.mxu0 %v2378_v8  ;;  %518 = vmatprep.mubr.f32.mxu1 %v2378_v8  ;;  %v351_v20 = vld [vmem:[%s2370_s1 + $0x18] sm:$0xff]  ;;  %v564_v22 = vld [vmem:[%s2372_s3 + $0x8] sm:$0xff]  ;;  %v1787_v23 = vmov 0   ;;  %v565_v24 = vld [vmem:[%s2372_s3 + $0x10] sm:$0xff]  ;;  %vm587_vm1 = vcmask 261120  }
  0x24   : > { %s1901_s26 = scalar_lea.vmem [#allocation2], %s1896_s25  ;;  %v566_v21 = vld [vmem:[%s2372_s3 + $0x18] sm:$0xff]  ;;  %1714 = vset.pattern.permute.xlu0 %v1787_v23  ;;  %1715 = vset.pattern.permute.xlu1 %v1787_v23  ;;  %v563_v25 = vld [vmem:[%s2372_s3] sm:$0xff]  ;;  %v824_v27 = vld [vmem:[%s2374_s5 + $0x70] sm:$0xff]  ;;  %s2300_s20 = scalar_lea.vmem [#allocation3], %s1896_s25 }
  0x25   : > { %v345_v9 = vld [vmem:[%s1901_s26 + $0x28] sm:$0xff]  ;;  %v347_v10 = vld [vmem:[%s1901_s26 + $0x38] sm:$0xff]  ;;  %v344_v11 = vld [vmem:[%s1901_s26 + $0x20] sm:$0xff]  ;;  %584 = vperm.xlu0 %1714, %v566_v21   ;;  %574 = vperm.xlu1 %1715, %v564_v22   ;;  %s1538_s21 = sshll.u32 %s2300_s20, 4  ;;  %s1669_s25 = sshll.u32 %s1605_s9, 9  ;;  %s2309_s21 = int_to_ptr.vmem [resolvable:$true] %s1538_s21 }
  0x26   : > { %393 = vmatprep.subr.mxu0 %v345_v9  ;;  %482 = vmatprep.subr.mxu1 %v347_v10  ;;  %v346_v12 = vld [vmem:[%s1901_s26 + $0x30] sm:$0xff]  ;;  %v341_v13 = vld [vmem:[%s1901_s26 + $0x8] sm:$0xff]  ;;  %v343_v14 = vld [vmem:[%s1901_s26 + $0x18] sm:$0xff]  ;;  %s2318_s23 = scalar_lea.hbm %s2377_s8, %s1669_s25  ;;  %s2328_s10 = scalar_lea.sflag [#allocation4], %s305_s24 }
  0x27   : > { %394 = vmatpush1.msra.mxu0 %v344_v11  ;;  %483 = vmatpush1.msra.mxu1 %v346_v12  ;;  %v340_v15 = vld [vmem:[%s1901_s26] sm:$0xff]  ;;  %v342_v16 = vld [vmem:[%s1901_s26 + $0x10] sm:$0xff]  ;;  %v825_v26 = vld [vmem:[%s2374_s5 + $0x78] sm:$0xff]  ;;  %s1724_s12 = scalar_lea.vmem %s2309_s21, 1024  ;;  %s1788_s13 = smov [#allocation3]  }
  0x28   : > { %395 = vmatprep.subr.mxu0 %v341_v13  ;;  %484 = vmatprep.subr.mxu1 %v343_v14  ;;  %v823_v28 = vld [vmem:[%s2374_s5 + $0x68] sm:$0xff]  ;;  %v822_v29 = vld [vmem:[%s2374_s5 + $0x60] sm:$0xff]  ;;  %v821_v30 = vld [vmem:[%s2374_s5 + $0x58] sm:$0xff]  ;;  %p1725_p13 = scmp.ne.s32.totalorder %s2309_s21, %s1724_s12  ;;  %s1728_s17 = sshll.u32 %s1788_s13, 4  ;;  %s1729_s17 = int_to_ptr.vmem [resolvable:$false] %s1728_s17 }
  0x29   : > { %396 = vmatpush1.msra.mxu0 %v340_v15  ;;  %485 = vmatpush1.msra.mxu1 %v342_v16  ;;  %v820_v31 = vld [vmem:[%s2374_s5 + $0x50] sm:$0xff]  ;;  %v819_v32 = vld [vmem:[%s2374_s5 + $0x48] sm:$0xff]  ;;  %v818_v33 = vld [vmem:[%s2374_s5 + $0x40] sm:$0xff]  ;;  %s1730_s18 = scalar_lea.vmem %s1729_s17, 2048  ;;  %p1731_p2 = scmp.lt.s32.totalorder %s2309_s21, %s1729_s17 }
  0x2a   : > { %1615 = vmatmul.mubr.msk.f32.vlgmr.msra.gmra.mxu0 %vm352_vm0, %v348_v17  ;;  %1619 = vmatmul.mubr.msk.f32.vlgmr.msra.gmra.mxu1 %vm352_vm0, %v348_v17  ;;  %v817_v34 = vld [vmem:[%s2374_s5 + $0x38] sm:$0xff]  ;;  %v816_v35 = vld [vmem:[%s2374_s5 + $0x30] sm:$0xff]  ;;  %v815_v36 = vld [vmem:[%s2374_s5 + $0x28] sm:$0xff]  ;;  %p1726_p0 = pnand %p1725_p13, %p1875_p6  ;;  %p1732_p3 = scmp.lt.s32.totalorder %s1730_s18, %s1724_s12 }
  0x2b   : > { %435 = vmatprep.mubr.f32.mxu0 %v2378_v8  ;;  %524 = vmatprep.mubr.f32.mxu1 %v2378_v8  ;;  %v814_v37 = vld [vmem:[%s2374_s5 + $0x20] sm:$0xff]  ;;  %v813_v38 = vld [vmem:[%s2374_s5 + $0x18] sm:$0xff]  ;;  %v812_v39 = vld [vmem:[%s2374_s5 + $0x10] sm:$0xff] }
  0x2c   : > { %579 = vperm.xlu0 %1714, %v565_v24   ;;  %569 = vperm.xlu1 %1715, %v563_v25   ;;  %v811_v40 = vld [vmem:[%s2374_s5 + $0x8] sm:$0xff]  ;;  %v810_v41 = vld [vmem:[%s2374_s5] sm:$0xff]  ;;  %v545_v15 = vld [vmem:[%s2371_s2 + $0x10] sm:$0xff]  ;;  %p1727_p1 = pneg %p1726_p0  ;;  %p1733_p4 = por %p1732_p3, %p1731_p2 }
  0x2d   : > { %v1342_v42 = vld [vmem:[%s2376_s7] sm:$0xff]  ;;  %v1343_v43 = vld [vmem:[%s2376_s7 + $0x8] sm:$0xff]  ;;  %v546_v16 = vld [vmem:[%s2371_s2 + $0x18] sm:$0xff] }
  0x2e   : > { %1616 = vmatmul.mubr.msk.f32.gmra.mxu0 %vm352_vm0, %v349_v18  ;;  %1620 = vmatmul.mubr.msk.f32.gmra.mxu1 %vm352_vm0, %v349_v18  ;;  %v543_v13 = vld [vmem:[%s2371_s2] sm:$0xff]  ;;  %v544_v14 = vld [vmem:[%s2371_s2 + $0x8] sm:$0xff]  ;;  %p1734_p5 = pnand %p1733_p4, %p1727_p1 }
  0x2f   : > { %441 = vmatprep.mubr.f32.mxu0 %v2378_v8  ;;  %530 = vmatprep.mubr.f32.mxu1 %v2378_v8 }
  0x30   : > { %903 = vperm.xlu0 %1714, %v825_v26   ;;  %898 = vperm.xlu1 %1715, %v824_v27  }
  0x32   : > { %1617 = vmatmul.mubr.msk.f32.gmra.mxu0 %vm352_vm0, %v350_v19  ;;  %1621 = vmatmul.mubr.msk.f32.gmra.mxu1 %vm352_vm0, %v350_v19 }
  0x33   : > { %447 = vmatprep.mubr.f32.mxu0 %v2378_v8  ;;  %536 = vmatprep.mubr.f32.mxu1 %v2378_v8 }
  0x34   : > { %893 = vperm.xlu0 %1714, %v823_v28   ;;  %888 = vperm.xlu1 %1715, %v822_v29  }
  0x36   : > { %1618 = vmatmul.mubr.msk.f32.gmra.mxu0 %vm352_vm0, %v351_v20  ;;  %1622 = vmatmul.mubr.msk.f32.gmra.mxu1 %vm352_vm0, %v351_v20 }
  0x37   : > { %664 = vmatprep.mubr.f32.mxu0 %v2378_v8  ;;  %753 = vmatprep.mubr.f32.mxu1 %v2378_v8 }
  0x38   : > { %883 = vperm.xlu0 %1714, %v821_v30   ;;  %878 = vperm.xlu1 %1715, %v820_v31  }
  0x3c   : > { %873 = vperm.xlu0 %1714, %v819_v32   ;;  %868 = vperm.xlu1 %1715, %v818_v33  }
  0x40   : > { %863 = vperm.xlu0 %1714, %v817_v34   ;;  %858 = vperm.xlu1 %1715, %v816_v35  }
  0x44   : > { %853 = vperm.xlu0 %1714, %v815_v36   ;;  %848 = vperm.xlu1 %1715, %v814_v37  }
  0x48   : > { %843 = vperm.xlu0 %1714, %v813_v38   ;;  %838 = vperm.xlu1 %1715, %v812_v39  }
  0x4c   : > { %833 = vperm.xlu0 %1714, %v811_v40   ;;  %828 = vperm.xlu1 %1715, %v810_v41  }
  0x50   : > { %1346 = vperm.xlu0 %1714, %v1342_v42   ;;  %1351 = vperm.xlu1 %1715, %v1343_v43  }
  0xa0   : > { %v585_v25 = vpop.permute.xlu0 %584  ;;  %v575_v30 = vpop.permute.xlu1 %574 }
  0xa7   : > { %v580_v33 = vpop.permute.xlu0 %579 }
  0xea   : > { %v431_v44 = vpop.f32.mrf.mxu0  ;;  %v520_v45 = vpop.f32.mrf.mxu1 }
  0xeb   : > { %v547_v11 = vmax.f32 %v431_v44, 0.0  ;;  %v549_v12 = vmax.f32 %v520_v45, 0.0 }
  0xec   : > { %v433_v46 = vpop.f32.mrf.mxu0  ;;  %v522_v47 = vpop.f32.mrf.mxu1 }
  0xed   : > { %v548_v9 = vmax.f32 %v433_v46, 0.0  ;;  %v550_v10 = vmax.f32 %v522_v47, 0.0 }
  0xee   : > { %v437_v48 = vpop.f32.mrf.mxu0  ;;  %v526_v49 = vpop.f32.mrf.mxu1 }
  0xef   : > { %v551_v6 = vmax.f32 %v437_v48, 0.0  ;;  %v553_v7 = vmax.f32 %v526_v49, 0.0  ;;  %v570_v48 = vpop.permute.xlu1 %569 }
  0xf0   : > { %v439_v50 = vpop.f32.mrf.mxu0  ;;  %v528_v51 = vpop.f32.mrf.mxu1 }
  0xf1   : > { %v552_v4 = vmax.f32 %v439_v50, 0.0  ;;  %v554_v5 = vmax.f32 %v528_v51, 0.0 }
  0xf2   : > { %v443_v52 = vpop.f32.mrf.mxu0  ;;  %v532_v53 = vpop.f32.mrf.mxu1 }
  0xf3   : > { %v555_v2 = vmax.f32 %v443_v52, 0.0  ;;  %v557_v3 = vmax.f32 %v532_v53, 0.0 }
  0xf4   : > { %v445_v54 = vpop.f32.mrf.mxu0  ;;  %v534_v55 = vpop.f32.mrf.mxu1 }
  0xf5   : > { %v556_v0 = vmax.f32 %v445_v54, 0.0  ;;  %v558_v1 = vmax.f32 %v534_v55, 0.0 }
  0xf6   : > { %v449_v56 = vpop.f32.mrf.mxu0  ;;  %v538_v57 = vpop.f32.mrf.mxu1 }
  0xf7   : > { %v559_v62 = vmax.f32 %v449_v56, 0.0  ;;  %v561_v63 = vmax.f32 %v538_v57, 0.0 }
  0xf8   : > { %v451_v58 = vpop.f32.mrf.mxu0  ;;  %v540_v59 = vpop.f32.mrf.mxu1 }
  0xf9   : > { %v560_v60 = vmax.f32 %v451_v58, 0.0  ;;  %v562_v61 = vmax.f32 %v540_v59, 0.0 }
  0xfb   : > { %624 = vmatprep.subr.mxu0 %v560_v60  ;;  %713 = vmatprep.subr.mxu1 %v562_v61 }
  0xfc   : > { %625 = vmatpush1.msra.mxu0 %v559_v62  ;;  %714 = vmatpush1.msra.mxu1 %v561_v63 }
  0xfd   : > { %626 = vmatprep.subr.mxu0 %v556_v0  ;;  %715 = vmatprep.subr.mxu1 %v558_v1 }
  0xfe   : > { %627 = vmatpush1.msra.mxu0 %v555_v2  ;;  %716 = vmatpush1.msra.mxu1 %v557_v3 }
  0xff   : > { %628 = vmatprep.subr.mxu0 %v552_v4  ;;  %717 = vmatprep.subr.mxu1 %v554_v5  ;;  %v778_v5 = vld [vmem:[%s2373_s4] sm:$0xff] }
 0x100   : > { %629 = vmatpush1.msra.mxu0 %v551_v6  ;;  %718 = vmatpush1.msra.mxu1 %v553_v7  ;;  %v779_v6 = vld [vmem:[%s2373_s4 + $0x8] sm:$0xff]  ;;  %v780_v7 = vld [vmem:[%s2373_s4 + $0x10] sm:$0xff] }
 0x101   : > { %630 = vmatprep.subr.mxu0 %v548_v9  ;;  %719 = vmatprep.subr.mxu1 %v550_v10  ;;  %v781_v9 = vld [vmem:[%s2373_s4 + $0x18] sm:$0xff]  ;;  %v782_v10 = vld [vmem:[%s2373_s4 + $0x20] sm:$0xff] }
 0x102   : > { %631 = vmatpush1.msra.mxu0 %v547_v11  ;;  %720 = vmatpush1.msra.mxu1 %v549_v12  ;;  %v783_v11 = vld [vmem:[%s2373_s4 + $0x28] sm:$0xff]  ;;  %v784_v12 = vld [vmem:[%s2373_s4 + $0x30] sm:$0xff] }
 0x103   : > { %1623 = vmatmul.mubr.msk.f32.vlgmr.msra.gmra.mxu0 %vm587_vm1, %v543_v13  ;;  %1627 = vmatmul.mubr.msk.f32.vlgmr.msra.gmra.mxu1 %vm587_vm1, %v543_v13  ;;  %v785_v13 = vld [vmem:[%s2373_s4 + $0x38] sm:$0xff] }
 0x104   : > { %670 = vmatprep.mubr.f32.mxu0 %v2378_v8  ;;  %759 = vmatprep.mubr.f32.mxu1 %v2378_v8 }
 0x107   : > { %1624 = vmatmul.mubr.msk.f32.gmra.mxu0 %vm587_vm1, %v544_v14  ;;  %1628 = vmatmul.mubr.msk.f32.gmra.mxu1 %vm587_vm1, %v544_v14  ;;  %v786_v14 = vld [vmem:[%s2373_s4 + $0x40] sm:$0xff] }
 0x108   : > { %676 = vmatprep.mubr.f32.mxu0 %v2378_v8  ;;  %765 = vmatprep.mubr.f32.mxu1 %v2378_v8 }
 0x10b   : > { %1625 = vmatmul.mubr.msk.f32.gmra.mxu0 %vm587_vm1, %v545_v15  ;;  %1629 = vmatmul.mubr.msk.f32.gmra.mxu1 %vm587_vm1, %v545_v15  ;;  %v787_v15 = vld [vmem:[%s2373_s4 + $0x48] sm:$0xff] }
 0x10c   : > { %682 = vmatprep.mubr.f32.mxu0 %v2378_v8  ;;  %771 = vmatprep.mubr.f32.mxu1 %v2378_v8 }
 0x10f   : > { %1626 = vmatmul.mubr.msk.f32.gmra.mxu0 %vm587_vm1, %v546_v16  ;;  %1630 = vmatmul.mubr.msk.f32.gmra.mxu1 %vm587_vm1, %v546_v16  ;;  %v788_v16 = vld [vmem:[%s2373_s4 + $0x50] sm:$0xff] }
 0x110   : > { %1018 = vmatprep.mubr.f32.mxu0 %v2378_v8  ;;  %1179 = vmatprep.mubr.f32.mxu1 %v2378_v8 }
 0x1c3   : > { %v666_v17 = vpop.f32.mrf.mxu0  ;;  %v755_v18 = vpop.f32.mrf.mxu1 }
 0x1c4   : > { %v667_v57 = vadd.f32 %v666_v17, %v570_v48  ;;  %v756_v58 = vadd.f32 %v755_v18, %v570_v48  ;;  %v789_v17 = vld [vmem:[%s2373_s4 + $0x58] sm:$0xff]  ;;  %v790_v18 = vld [vmem:[%s2373_s4 + $0x60] sm:$0xff] }
 0x1c5   : > { %v668_v19 = vpop.f32.mrf.mxu0  ;;  %v757_v20 = vpop.f32.mrf.mxu1 }
 0x1c6   : > { %v669_v53 = vadd.f32 %v668_v19, %v570_v48  ;;  %v758_v54 = vadd.f32 %v757_v20, %v570_v48  ;;  %v794_v3 = vmax.f32 %v667_v57, 0.0  ;;  %v796_v4 = vmax.f32 %v756_v58, 0.0  ;;  %v791_v19 = vld [vmem:[%s2373_s4 + $0x68] sm:$0xff]  ;;  %v792_v20 = vld [vmem:[%s2373_s4 + $0x70] sm:$0xff] }
 0x1c7   : > { %v672_v21 = vpop.f32.mrf.mxu0  ;;  %v761_v22 = vpop.f32.mrf.mxu1 }
 0x1c8   : > { %v673_v49 = vadd.f32 %v672_v21, %v575_v30  ;;  %v762_v50 = vadd.f32 %v761_v22, %v575_v30  ;;  %v795_v1 = vmax.f32 %v669_v53, 0.0  ;;  %v797_v2 = vmax.f32 %v758_v54, 0.0  ;;  %v793_v21 = vld [vmem:[%s2373_s4 + $0x78] sm:$0xff] }
 0x1c9   : > { %v674_v23 = vpop.f32.mrf.mxu0  ;;  %v763_v24 = vpop.f32.mrf.mxu1 }
 0x1ca   : > { %v675_v44 = vadd.f32 %v674_v23, %v575_v30  ;;  %v764_v45 = vadd.f32 %v763_v24, %v575_v30  ;;  %v798_v63 = vmax.f32 %v673_v49, 0.0  ;;  %v800_v0 = vmax.f32 %v762_v50, 0.0 }
 0x1cb   : > { %v678_v26 = vpop.f32.mrf.mxu0  ;;  %v767_v27 = vpop.f32.mrf.mxu1 }
 0x1cc   : > { %v679_v42 = vadd.f32 %v678_v26, %v580_v33  ;;  %v768_v43 = vadd.f32 %v767_v27, %v580_v33  ;;  %v799_v61 = vmax.f32 %v675_v44, 0.0  ;;  %v801_v62 = vmax.f32 %v764_v45, 0.0 }
 0x1cd   : > { %v680_v28 = vpop.f32.mrf.mxu0  ;;  %v769_v29 = vpop.f32.mrf.mxu1 }
 0x1ce   : > { %v681_v38 = vadd.f32 %v680_v28, %v580_v33  ;;  %v770_v39 = vadd.f32 %v769_v29, %v580_v33  ;;  %v802_v59 = vmax.f32 %v679_v42, 0.0  ;;  %v804_v60 = vmax.f32 %v768_v43, 0.0 }
 0x1cf   : > { %v684_v31 = vpop.f32.mrf.mxu0  ;;  %v773_v32 = vpop.f32.mrf.mxu1 }
 0x1d0   : > { %v685_v34 = vadd.f32 %v684_v31, %v585_v25  ;;  %v774_v35 = vadd.f32 %v773_v32, %v585_v25  ;;  %v803_v55 = vmax.f32 %v681_v38, 0.0  ;;  %v805_v56 = vmax.f32 %v770_v39, 0.0 }
 0x1d1   : > { %v686_v36 = vpop.f32.mrf.mxu0  ;;  %v775_v37 = vpop.f32.mrf.mxu1 }
 0x1d2   : > { %v687_v40 = vadd.f32 %v686_v36, %v585_v25  ;;  %v776_v41 = vadd.f32 %v775_v37, %v585_v25  ;;  %v806_v51 = vmax.f32 %v685_v34, 0.0  ;;  %v808_v52 = vmax.f32 %v774_v35, 0.0 }
 0x1d4   : > { %v807_v46 = vmax.f32 %v687_v40, 0.0  ;;  %v809_v47 = vmax.f32 %v776_v41, 0.0 }
 0x1d6   : > { %978 = vmatprep.subr.mxu0 %v807_v46  ;;  %1139 = vmatprep.subr.mxu1 %v809_v47 }
 0x1d7   : > { %979 = vmatpush1.msra.mxu0 %v806_v51  ;;  %1140 = vmatpush1.msra.mxu1 %v808_v52 }
 0x1d8   : > { %980 = vmatprep.subr.mxu0 %v803_v55  ;;  %1141 = vmatprep.subr.mxu1 %v805_v56 }
 0x1d9   : > { %981 = vmatpush1.msra.mxu0 %v802_v59  ;;  %1142 = vmatpush1.msra.mxu1 %v804_v60 }
 0x1da   : > { %982 = vmatprep.subr.mxu0 %v799_v61  ;;  %1143 = vmatprep.subr.mxu1 %v801_v62 }
 0x1db   : > { %983 = vmatpush1.msra.mxu0 %v798_v63  ;;  %1144 = vmatpush1.msra.mxu1 %v800_v0 }
 0x1dc   : > { %984 = vmatprep.subr.mxu0 %v795_v1  ;;  %1145 = vmatprep.subr.mxu1 %v797_v2 }
 0x1dd   : > { %985 = vmatpush1.msra.mxu0 %v794_v3  ;;  %1146 = vmatpush1.msra.mxu1 %v796_v4  ;;  %v904_v4 = vpop.permute.xlu0 %903 }
 0x1de   : > { %1631 = vmatmul.mubr.msk.f32.vlgmr.msra.gmra.mxu0 %vm587_vm1, %v778_v5  ;;  %1647 = vmatmul.mubr.msk.f32.vlgmr.msra.gmra.mxu1 %vm587_vm1, %v778_v5 }
 0x1df   : > { %1024 = vmatprep.mubr.f32.mxu0 %v2378_v8  ;;  %1185 = vmatprep.mubr.f32.mxu1 %v2378_v8 }
 0x1e2   : > { %1632 = vmatmul.mubr.msk.f32.gmra.mxu0 %vm587_vm1, %v779_v6  ;;  %1648 = vmatmul.mubr.msk.f32.gmra.mxu1 %vm587_vm1, %v779_v6 }
 0x1e3   : > { %1030 = vmatprep.mubr.f32.mxu0 %v2378_v8  ;;  %1191 = vmatprep.mubr.f32.mxu1 %v2378_v8 }
 0x1e6   : > { %1633 = vmatmul.mubr.msk.f32.gmra.mxu0 %vm587_vm1, %v780_v7  ;;  %1649 = vmatmul.mubr.msk.f32.gmra.mxu1 %vm587_vm1, %v780_v7  ;;  %v899_v7 = vpop.permute.xlu1 %898 }
 0x1e7   : > { %1036 = vmatprep.mubr.f32.mxu0 %v2378_v8  ;;  %1197 = vmatprep.mubr.f32.mxu1 %v2378_v8 }
 0x1ea   : > { %1634 = vmatmul.mubr.msk.f32.gmra.mxu0 %vm587_vm1, %v781_v9  ;;  %1650 = vmatmul.mubr.msk.f32.gmra.mxu1 %vm587_vm1, %v781_v9 }
 0x1eb   : > { %1042 = vmatprep.mubr.f32.mxu0 %v2378_v8  ;;  %1203 = vmatprep.mubr.f32.mxu1 %v2378_v8 }
 0x1ee   : > { %1635 = vmatmul.mubr.msk.f32.gmra.mxu0 %vm587_vm1, %v782_v10  ;;  %1651 = vmatmul.mubr.msk.f32.gmra.mxu1 %vm587_vm1, %v782_v10 }
 0x1ef   : > { %1048 = vmatprep.mubr.f32.mxu0 %v2378_v8  ;;  %1209 = vmatprep.mubr.f32.mxu1 %v2378_v8 }
 0x1f2   : > { %1636 = vmatmul.mubr.msk.f32.gmra.mxu0 %vm587_vm1, %v783_v11  ;;  %1652 = vmatmul.mubr.msk.f32.gmra.mxu1 %vm587_vm1, %v783_v11 }
 0x1f3   : > { %1054 = vmatprep.mubr.f32.mxu0 %v2378_v8  ;;  %1215 = vmatprep.mubr.f32.mxu1 %v2378_v8 }
 0x1f6   : > { %1637 = vmatmul.mubr.msk.f32.gmra.mxu0 %vm587_vm1, %v784_v12  ;;  %1653 = vmatmul.mubr.msk.f32.gmra.mxu1 %vm587_vm1, %v784_v12 }
 0x1f7   : > { %1060 = vmatprep.mubr.f32.mxu0 %v2378_v8  ;;  %1221 = vmatprep.mubr.f32.mxu1 %v2378_v8 }
 0x1fa   : > { %1638 = vmatmul.mubr.msk.f32.gmra.mxu0 %vm587_vm1, %v785_v13  ;;  %1654 = vmatmul.mubr.msk.f32.gmra.mxu1 %vm587_vm1, %v785_v13  ;;  %v894_v13 = vpop.permute.xlu0 %893 }
 0x1fb   : > { %1066 = vmatprep.mubr.f32.mxu0 %v2378_v8  ;;  %1227 = vmatprep.mubr.f32.mxu1 %v2378_v8 }
 0x1fe   : > { %1639 = vmatmul.mubr.msk.f32.gmra.mxu0 %vm587_vm1, %v786_v14  ;;  %1655 = vmatmul.mubr.msk.f32.gmra.mxu1 %vm587_vm1, %v786_v14 }
 0x1ff   : > { %1072 = vmatprep.mubr.f32.mxu0 %v2378_v8  ;;  %1233 = vmatprep.mubr.f32.mxu1 %v2378_v8 }
 0x202   : > { %1640 = vmatmul.mubr.msk.f32.gmra.mxu0 %vm587_vm1, %v787_v15  ;;  %1656 = vmatmul.mubr.msk.f32.gmra.mxu1 %vm587_vm1, %v787_v15 }
 0x203   : > { %1078 = vmatprep.mubr.f32.mxu0 %v2378_v8  ;;  %1239 = vmatprep.mubr.f32.mxu1 %v2378_v8 }
 0x206   : > { %1641 = vmatmul.mubr.msk.f32.gmra.mxu0 %vm587_vm1, %v788_v16  ;;  %1657 = vmatmul.mubr.msk.f32.gmra.mxu1 %vm587_vm1, %v788_v16  ;;  %v889_v16 = vpop.permute.xlu1 %888 }
 0x207   : > { %1084 = vmatprep.mubr.f32.mxu0 %v2378_v8  ;;  %1245 = vmatprep.mubr.f32.mxu1 %v2378_v8 }
 0x20a   : > { %1642 = vmatmul.mubr.msk.f32.gmra.mxu0 %vm587_vm1, %v789_v17  ;;  %1658 = vmatmul.mubr.msk.f32.gmra.mxu1 %vm587_vm1, %v789_v17 }
 0x20b   : > { %1090 = vmatprep.mubr.f32.mxu0 %v2378_v8  ;;  %1251 = vmatprep.mubr.f32.mxu1 %v2378_v8 }
 0x20e   : > { %1643 = vmatmul.mubr.msk.f32.gmra.mxu0 %vm587_vm1, %v790_v18  ;;  %1659 = vmatmul.mubr.msk.f32.gmra.mxu1 %vm587_vm1, %v790_v18 }
 0x20f   : > { %1096 = vmatprep.mubr.f32.mxu0 %v2378_v8  ;;  %1257 = vmatprep.mubr.f32.mxu1 %v2378_v8 }
 0x212   : > { %1644 = vmatmul.mubr.msk.f32.gmra.mxu0 %vm587_vm1, %v791_v19  ;;  %1660 = vmatmul.mubr.msk.f32.gmra.mxu1 %vm587_vm1, %v791_v19 }
 0x213   : > { %1102 = vmatprep.mubr.f32.mxu0 %v2378_v8  ;;  %1263 = vmatprep.mubr.f32.mxu1 %v2378_v8 }
 0x216   : > { %1645 = vmatmul.mubr.msk.f32.gmra.mxu0 %vm587_vm1, %v792_v20  ;;  %1661 = vmatmul.mubr.msk.f32.gmra.mxu1 %vm587_vm1, %v792_v20 }
 0x217   : > { %1108 = vmatprep.mubr.f32.mxu0 %v2378_v8  ;;  %1269 = vmatprep.mubr.f32.mxu1 %v2378_v8 }
 0x21a   : > { %1646 = vmatmul.mubr.msk.f32.gmra.mxu0 %vm587_vm1, %v793_v21  ;;  %1662 = vmatmul.mubr.msk.f32.gmra.mxu1 %vm587_vm1, %v793_v21  ;;  %v884_v21 = vpop.permute.xlu0 %883 }
 0x21b   : > { %1418 = vmatprep.mubr.f32.mxu0 %v2378_v8  ;;  %1495 = vmatprep.mubr.f32.mxu1 %v2378_v8 }
 0x29e   : > { %v2145_v22 = vpop.f32.mrf.mxu0  ;;  %v2147_v23 = vpop.f32.mrf.mxu1 }
 0x29f   : > { %2382 = vst [vmem:[#allocation6_spill] sm:$0xff] %v2145_v22  ;;  %2383 = vst [vmem:[#allocation7_spill] sm:$0xff] %v2147_v23  ;;  %v879_v22 = vpop.permute.xlu1 %878 }
 0x2a0   : > { %v2149_v24 = vpop.f32.mrf.mxu0  ;;  %v2151_v25 = vpop.f32.mrf.mxu1 }
 0x2a1   : > { %2384 = vst [vmem:[#allocation8_spill] sm:$0xff] %v2149_v24  ;;  %2385 = vst [vmem:[#allocation9_spill] sm:$0xff] %v2151_v25 }
 0x2a2   : > { %v2153_v26 = vpop.f32.mrf.mxu0  ;;  %v2155_v27 = vpop.f32.mrf.mxu1 }
 0x2a3   : > { %2386 = vst [vmem:[#allocation10_spill] sm:$0xff] %v2153_v26  ;;  %2387 = vst [vmem:[#allocation11_spill] sm:$0xff] %v2155_v27 }
 0x2a4   : > { %v2157_v28 = vpop.f32.mrf.mxu0  ;;  %v2159_v29 = vpop.f32.mrf.mxu1 }
 0x2a5   : > { %2388 = vst [vmem:[#allocation12_spill] sm:$0xff] %v2157_v28  ;;  %2389 = vst [vmem:[#allocation13_spill] sm:$0xff] %v2159_v29 }
 0x2a6   : > { %v2161_v30 = vpop.f32.mrf.mxu0  ;;  %v2163_v31 = vpop.f32.mrf.mxu1 }
 0x2a7   : > { %2390 = vst [vmem:[#allocation14_spill] sm:$0xff] %v2161_v30  ;;  %2391 = vst [vmem:[#allocation15_spill] sm:$0xff] %v2163_v31 }
 0x2a8   : > { %v2165_v32 = vpop.f32.mrf.mxu0  ;;  %v2167_v33 = vpop.f32.mrf.mxu1 }
 0x2a9   : > { %2392 = vst [vmem:[#allocation16_spill] sm:$0xff] %v2165_v32  ;;  %2393 = vst [vmem:[#allocation17_spill] sm:$0xff] %v2167_v33 }
 0x2aa   : > { %v2169_v34 = vpop.f32.mrf.mxu0  ;;  %v2171_v35 = vpop.f32.mrf.mxu1 }
 0x2ab   : > { %2394 = vst [vmem:[#allocation18_spill] sm:$0xff] %v2169_v34  ;;  %2395 = vst [vmem:[#allocation19_spill] sm:$0xff] %v2171_v35  ;;  %v874_v35 = vpop.permute.xlu0 %873 }
 0x2ac   : > { %v2173_v36 = vpop.f32.mrf.mxu0  ;;  %v2175_v37 = vpop.f32.mrf.mxu1 }
 0x2ad   : > { %2396 = vst [vmem:[#allocation20_spill] sm:$0xff] %v2173_v36  ;;  %2397 = vst [vmem:[#allocation21_spill] sm:$0xff] %v2175_v37 }
 0x2ae   : > { %v2177_v38 = vpop.f32.mrf.mxu0  ;;  %v2179_v39 = vpop.f32.mrf.mxu1 }
 0x2af   : > { %2398 = vst [vmem:[#allocation22_spill] sm:$0xff] %v2177_v38  ;;  %2399 = vst [vmem:[#allocation23_spill] sm:$0xff] %v2179_v39 }
 0x2b0   : > { %v2181_v40 = vpop.f32.mrf.mxu0  ;;  %v2183_v41 = vpop.f32.mrf.mxu1 }
 0x2b1   : > { %2400 = vst [vmem:[#allocation24_spill] sm:$0xff] %v2181_v40  ;;  %2401 = vst [vmem:[#allocation25_spill] sm:$0xff] %v2183_v41  ;;  %v2237_v40 = vpop.permute.xlu1 %868 }
 0x2b2   : > { %v2185_v42 = vpop.f32.mrf.mxu0  ;;  %v2187_v43 = vpop.f32.mrf.mxu1 }
 0x2b3   : > { %2402 = vst [vmem:[#allocation26_spill] sm:$0xff] %v2185_v42  ;;  %2403 = vst [vmem:[#allocation27_spill] sm:$0xff] %v2187_v43 }
 0x2b4   : > { %v2189_v44 = vpop.f32.mrf.mxu0  ;;  %v2191_v45 = vpop.f32.mrf.mxu1 }
 0x2b5   : > { %2404 = vst [vmem:[#allocation28_spill] sm:$0xff] %v2189_v44  ;;  %2405 = vst [vmem:[#allocation29_spill] sm:$0xff] %v2191_v45 }
 0x2b6   : > { %v2193_v46 = vpop.f32.mrf.mxu0  ;;  %v2195_v47 = vpop.f32.mrf.mxu1 }
 0x2b7   : > { %2406 = vst [vmem:[#allocation30_spill] sm:$0xff] %v2195_v47 }
 0x2b8   : > { %v2197_v48 = vpop.f32.mrf.mxu0  ;;  %v2199_v49 = vpop.f32.mrf.mxu1 }
 0x2ba   : > { %v2201_v50 = vpop.f32.mrf.mxu0  ;;  %v2203_v51 = vpop.f32.mrf.mxu1 }
 0x2bc   : > { %v2205_v52 = vpop.f32.mrf.mxu0  ;;  %v2207_v53 = vpop.f32.mrf.mxu1 }
 0x2be   : > { %v2209_v54 = vpop.f32.mrf.mxu0  ;;  %v2211_v55 = vpop.f32.mrf.mxu1 }
 0x2c0   : > { %v2213_v56 = vpop.f32.mrf.mxu0  ;;  %v2215_v57 = vpop.f32.mrf.mxu1 }
 0x2c2   : > { %v2217_v58 = vpop.f32.mrf.mxu0  ;;  %v2219_v59 = vpop.f32.mrf.mxu1 }
 0x2c4   : > { %v2221_v60 = vpop.f32.mrf.mxu0  ;;  %v2223_v61 = vpop.f32.mrf.mxu1 }
 0x2c6   : > { %v2225_v62 = vpop.f32.mrf.mxu0  ;;  %v2227_v63 = vpop.f32.mrf.mxu1 }
 0x2c8   : > { %v2229_v0 = vpop.f32.mrf.mxu0  ;;  %v2231_v1 = vpop.f32.mrf.mxu1 }
 0x2ca   : > { %v2233_v2 = vpop.f32.mrf.mxu0  ;;  %v2235_v3 = vpop.f32.mrf.mxu1 }
 0x2cc   : > { %v1088_v5 = vpop.f32.mrf.mxu0  ;;  %v1249_v6 = vpop.f32.mrf.mxu1 }
 0x2ce   : > { %v1092_v9 = vpop.f32.mrf.mxu0  ;;  %v1253_v10 = vpop.f32.mrf.mxu1 }
 0x2d0   : > { %v1094_v11 = vpop.f32.mrf.mxu0  ;;  %v1255_v12 = vpop.f32.mrf.mxu1 }
 0x2d1   : > { %v1256_v44 = vadd.f32 %v1255_v12, %v889_v16 }
 0x2d2   : > { %v1098_v14 = vpop.f32.mrf.mxu0  ;;  %v1259_v15 = vpop.f32.mrf.mxu1 }
 0x2d3   : > { %v1099_v43 = vadd.f32 %v1098_v14, %v894_v13  ;;  %v1260_v42 = vadd.f32 %v1259_v15, %v894_v13 }
 0x2d4   : > { %v1100_v17 = vpop.f32.mrf.mxu0  ;;  %v1261_v18 = vpop.f32.mrf.mxu1 }
 0x2d5   : > { %v1101_v36 = vadd.f32 %v1100_v17, %v894_v13  ;;  %v1262_v39 = vadd.f32 %v1261_v18, %v894_v13 }
 0x2d6   : > { %v1104_v19 = vpop.f32.mrf.mxu0  ;;  %v1265_v20 = vpop.f32.mrf.mxu1 }
 0x2d7   : > { %v1105_v34 = vadd.f32 %v1104_v19, %v899_v7  ;;  %v1266_v37 = vadd.f32 %v1265_v20, %v899_v7  ;;  %v1333_v17 = vmax.f32 %v1262_v39, 0.0  ;;  %v1081_v39 = vadd.f32 %v2225_v62, %v879_v22  ;;  %v2407_v19 = vld [vmem:[#allocation30_spill] sm:$0xff] }
 0x2d8   : > { %v1106_v8 = vpop.f32.mrf.mxu0  ;;  %v1267_v23 = vpop.f32.mrf.mxu1 }
 0x2d9   : > { %v1107_v31 = vadd.f32 %v1106_v8, %v899_v7  ;;  %v1268_v30 = vadd.f32 %v1267_v23, %v899_v7  ;;  %v1093_v23 = vadd.f32 %v1092_v9, %v889_v16  ;;  %v1331_v7 = vmax.f32 %v1101_v36, 0.0  ;;  %v859_v36 = vpop.permute.xlu1 %858 }
 0x2da   : > { %v1110_v25 = vpop.f32.mrf.mxu0  ;;  %v1271_v24 = vpop.f32.mrf.mxu1  ;;  %v1218_v20 = vadd.f32 %v2407_v19, %v859_v36  ;;  %v2427_v19 = vld [vmem:[#allocation11_spill] sm:$0xff] }
 0x2db   : > { %v1111_v27 = vadd.f32 %v1110_v25, %v904_v4  ;;  %v1272_v26 = vadd.f32 %v1271_v24, %v904_v4  ;;  %v1095_v24 = vadd.f32 %v1094_v11, %v889_v16  ;;  %v1335_v47 = vmax.f32 %v1107_v31, 0.0 }
 0x2dc   : > { %v1112_v29 = vpop.f32.mrf.mxu0  ;;  %v1273_v28 = vpop.f32.mrf.mxu1  ;;  %v1337_v8 = vmax.f32 %v1268_v30, 0.0  ;;  %v1248_v31 = vadd.f32 %v2235_v3, %v884_v21  ;;  %v1330_v30 = vmax.f32 %v1099_v43, 0.0  ;;  %v1238_v43 = vadd.f32 %v2223_v61, %v874_v35 }
 0x2dd   : > { %v1113_v33 = vadd.f32 %v1112_v29, %v904_v4  ;;  %v1274_v32 = vadd.f32 %v1273_v28, %v904_v4  ;;  %v1338_v45 = vmax.f32 %v1111_v27, 0.0  ;;  %v1340_v25 = vmax.f32 %v1272_v26, 0.0  ;;  %v864_v27 = vpop.permute.xlu0 %863  ;;  %v849_v13 = vpop.permute.xlu1 %848 }
 0x2de   : > { %v1254_v28 = vadd.f32 %v1253_v10, %v889_v16  ;;  %v1334_v29 = vmax.f32 %v1105_v34, 0.0  ;;  %v1336_v4 = vmax.f32 %v1266_v37, 0.0  ;;  %v1087_v26 = vadd.f32 %v2233_v2, %v884_v21 }
 0x2df   : > { %v1339_v38 = vmax.f32 %v1113_v33, 0.0  ;;  %v1341_v41 = vmax.f32 %v1274_v32, 0.0  ;;  %v1089_v33 = vadd.f32 %v1088_v5, %v884_v21  ;;  %v1250_v32 = vadd.f32 %v1249_v6, %v884_v21 }
 0x2e0   : > { %v1083_v34 = vadd.f32 %v2229_v0, %v879_v22  ;;  %v1244_v37 = vadd.f32 %v2231_v1, %v879_v22  ;;  %v1326_v2 = vmax.f32 %v1093_v23, 0.0  ;;  %v1328_v5 = vmax.f32 %v1254_v28, 0.0  ;;  %v2410_v28 = vld [vmem:[#allocation26_spill] sm:$0xff] }
 0x2e1   : > { %1354 = vmatprep.subr.mxu0 %v1339_v38  ;;  %1431 = vmatprep.subr.mxu1 %v1341_v41  ;;  %v1332_v38 = vmax.f32 %v1260_v42, 0.0  ;;  %v1327_v41 = vmax.f32 %v1095_v24, 0.0  ;;  %v1077_v42 = vadd.f32 %v2221_v60, %v874_v35  ;;  %v1323_v0 = vmax.f32 %v1089_v33, 0.0  ;;  %v854_v9 = vpop.permute.xlu0 %853  ;;  %v2409_v24 = vld [vmem:[#allocation29_spill] sm:$0xff] }
 0x2e2   : > { %1355 = vmatpush1.msra.mxu0 %v1338_v45  ;;  %1432 = vmatpush1.msra.mxu1 %v1340_v25  ;;  %v1329_v45 = vmax.f32 %v1256_v44, 0.0  ;;  %v1325_v3 = vmax.f32 %v1250_v32, 0.0  ;;  %v1075_v44 = vadd.f32 %v2217_v58, %v874_v35  ;;  %v1236_v1 = vadd.f32 %v2219_v59, %v874_v35 }
 0x2e3   : > { %1356 = vmatprep.subr.mxu0 %v1335_v47  ;;  %1433 = vmatprep.subr.mxu1 %v1337_v8  ;;  %v1242_v47 = vadd.f32 %v2227_v63, %v879_v22  ;;  %v1322_v6 = vmax.f32 %v1087_v26, 0.0  ;;  %v1324_v62 = vmax.f32 %v1248_v31, 0.0  ;;  %v1071_v22 = vadd.f32 %v2213_v56, %v2237_v40 }
 0x2e4   : > { %1357 = vmatpush1.msra.mxu0 %v1334_v29  ;;  %1434 = vmatpush1.msra.mxu1 %v1336_v4  ;;  %v1232_v60 = vadd.f32 %v2215_v57, %v2237_v40  ;;  %v1319_v63 = vmax.f32 %v1083_v34, 0.0  ;;  %v1321_v61 = vmax.f32 %v1244_v37, 0.0  ;;  %v1069_v58 = vadd.f32 %v2209_v54, %v2237_v40  ;;  %v2411_v4 = vld [vmem:[#allocation27_spill] sm:$0xff]  ;;  %v2414_v34 = vld [vmem:[#allocation22_spill] sm:$0xff] }
 0x2e5   : > { %1358 = vmatprep.subr.mxu0 %v1331_v7  ;;  %1435 = vmatprep.subr.mxu1 %v1333_v17  ;;  %v1230_v35 = vadd.f32 %v2211_v55, %v2237_v40  ;;  %v1318_v59 = vmax.f32 %v1081_v39, 0.0  ;;  %v1320_v10 = vmax.f32 %v1242_v47, 0.0  ;;  %v1065_v56 = vadd.f32 %v2205_v52, %v864_v27  ;;  %v2412_v7 = vld [vmem:[#allocation24_spill] sm:$0xff] }
 0x2e6   : > { %1359 = vmatpush1.msra.mxu0 %v1330_v30  ;;  %1436 = vmatpush1.msra.mxu1 %v1332_v38  ;;  %v1226_v11 = vadd.f32 %v2207_v53, %v864_v27  ;;  %v1315_v57 = vmax.f32 %v1077_v42, 0.0  ;;  %v1317_v12 = vmax.f32 %v1238_v43, 0.0  ;;  %v1063_v14 = vadd.f32 %v2201_v50, %v864_v27  ;;  %v839_v38 = vpop.permute.xlu1 %838  ;;  %v2416_v47 = vld [vmem:[#allocation20_spill] sm:$0xff] }
 0x2e7   : > { %1360 = vmatprep.subr.mxu0 %v1327_v41  ;;  %1437 = vmatprep.subr.mxu1 %v1329_v45  ;;  %v1224_v54 = vadd.f32 %v2203_v51, %v864_v27  ;;  %v1314_v15 = vmax.f32 %v1075_v44, 0.0  ;;  %v1316_v16 = vmax.f32 %v1236_v1, 0.0  ;;  %v1059_v40 = vadd.f32 %v2197_v48, %v859_v36  ;;  %v2408_v51 = vld [vmem:[#allocation28_spill] sm:$0xff]  ;;  %v2413_v27 = vld [vmem:[#allocation25_spill] sm:$0xff]  ;;  %v2415_v41 = vld [vmem:[#allocation23_spill] sm:$0xff] }
 0x2e8   : > { %1361 = vmatpush1.msra.mxu0 %v1326_v2  ;;  %1438 = vmatpush1.msra.mxu1 %v1328_v5  ;;  %v1220_v55 = vadd.f32 %v2199_v49, %v859_v36  ;;  %v1311_v52 = vmax.f32 %v1071_v22, 0.0  ;;  %v1313_v18 = vmax.f32 %v1232_v60, 0.0  ;;  %v1057_v53 = vadd.f32 %v2193_v46, %v859_v36  ;;  %v844_v49 = vpop.permute.xlu0 %843  ;;  %v2417_v5 = vld [vmem:[#allocation21_spill] sm:$0xff]  ;;  %v2419_v1 = vld [vmem:[#allocation19_spill] sm:$0xff]  ;;  %v2420_v60 = vld [vmem:[#allocation16_spill] sm:$0xff] }
 0x2e9   : > { %1362 = vmatprep.subr.mxu0 %v1323_v0  ;;  %1439 = vmatprep.subr.mxu1 %v1325_v3  ;;  %v1310_v21 = vmax.f32 %v1069_v58, 0.0  ;;  %v1312_v50 = vmax.f32 %v1230_v35, 0.0  ;;  %v1053_v25 = vadd.f32 %v2408_v51, %v854_v9  ;;  %v1214_v8 = vadd.f32 %v2409_v24, %v854_v9  ;;  %v2418_v3 = vld [vmem:[#allocation18_spill] sm:$0xff]  ;;  %v2428_v51 = vld [vmem:[#allocation8_spill] sm:$0xff]  ;;  %v2429_v24 = vld [vmem:[#allocation9_spill] sm:$0xff] }
 0x2ea   : > { %1363 = vmatpush1.msra.mxu0 %v1322_v6  ;;  %1440 = vmatpush1.msra.mxu1 %v1324_v62  ;;  %v1307_v23 = vmax.f32 %v1065_v56, 0.0  ;;  %v1309_v48 = vmax.f32 %v1226_v11, 0.0  ;;  %v1051_v29 = vadd.f32 %v2410_v28, %v854_v9  ;;  %v1212_v33 = vadd.f32 %v2411_v4, %v854_v9  ;;  %v2423_v11 = vld [vmem:[#allocation15_spill] sm:$0xff] }
 0x2eb   : > { %1364 = vmatprep.subr.mxu0 %v1319_v63  ;;  %1441 = vmatprep.subr.mxu1 %v1321_v61  ;;  %v1306_v46 = vmax.f32 %v1063_v14, 0.0  ;;  %v1308_v32 = vmax.f32 %v1224_v54, 0.0  ;;  %v1047_v17 = vadd.f32 %v2412_v7, %v849_v13  ;;  %v1208_v26 = vadd.f32 %v2413_v27, %v849_v13  ;;  %v2421_v61 = vld [vmem:[#allocation17_spill] sm:$0xff]  ;;  %v2424_v14 = vld [vmem:[#allocation12_spill] sm:$0xff] }
 0x2ec   : > { %1365 = vmatpush1.msra.mxu0 %v1318_v59  ;;  %1442 = vmatpush1.msra.mxu1 %v1320_v10  ;;  %v1303_v31 = vmax.f32 %v1059_v40, 0.0  ;;  %v1305_v30 = vmax.f32 %v1220_v55, 0.0  ;;  %v1045_v37 = vadd.f32 %v2414_v34, %v849_v13  ;;  %v1206_v45 = vadd.f32 %v2415_v41, %v849_v13  ;;  %v834_v59 = vpop.permute.xlu0 %833  ;;  %v2422_v10 = vld [vmem:[#allocation14_spill] sm:$0xff]  ;;  %v1277_v41 = vld [vmem:[%s2375_s6 + $0x8] sm:$0xff] }
 0x2ed   : > { %1366 = vmatprep.subr.mxu0 %v1315_v57  ;;  %1443 = vmatprep.subr.mxu1 %v1317_v12  ;;  %v1302_v36 = vmax.f32 %v1057_v53, 0.0  ;;  %v1304_v39 = vmax.f32 %v1218_v20, 0.0  ;;  %v1041_v2 = vadd.f32 %v2416_v47, %v844_v49  ;;  %v1202_v42 = vadd.f32 %v2417_v5, %v844_v49  ;;  %v1276_v34 = vld [vmem:[%s2375_s6] sm:$0xff] }
 0x2ee   : > { %1367 = vmatpush1.msra.mxu0 %v1314_v15  ;;  %1444 = vmatpush1.msra.mxu1 %v1316_v16  ;;  %v1299_v43 = vmax.f32 %v1053_v25, 0.0  ;;  %v1301_v0 = vmax.f32 %v1214_v8, 0.0  ;;  %v1039_v44 = vadd.f32 %v2418_v3, %v844_v49  ;;  %v1200_v6 = vadd.f32 %v2419_v1, %v844_v49  ;;  %v2425_v15 = vld [vmem:[#allocation13_spill] sm:$0xff]  ;;  %v2430_v49 = vld [vmem:[#allocation6_spill] sm:$0xff] }
 0x2ef   : > { %1368 = vmatprep.subr.mxu0 %v1311_v52  ;;  %1445 = vmatprep.subr.mxu1 %v1313_v18  ;;  %v1298_v62 = vmax.f32 %v1051_v29, 0.0  ;;  %v1300_v22 = vmax.f32 %v1212_v33, 0.0  ;;  %v1035_v63 = vadd.f32 %v2420_v60, %v839_v38  ;;  %v1196_v9 = vadd.f32 %v2421_v61, %v839_v38  ;;  %v829_v52 = vpop.permute.xlu1 %828  ;;  %v2426_v18 = vld [vmem:[#allocation10_spill] sm:$0xff]  ;;  %v2431_v29 = vld [vmem:[#allocation7_spill] sm:$0xff] }
 0x2f0   : > { %1369 = vmatpush1.msra.mxu0 %v1310_v21  ;;  %1446 = vmatpush1.msra.mxu1 %v1312_v50  ;;  %v1295_v58 = vmax.f32 %v1047_v17, 0.0  ;;  %v1297_v35 = vmax.f32 %v1208_v26, 0.0  ;;  %v1033_v56 = vadd.f32 %v2422_v10, %v839_v38  ;;  %v1194_v57 = vadd.f32 %v2423_v11, %v839_v38  ;;  %v1720_v11 = vld [vmem:[%s1901_s26 + $0x20] sm:$0xff] }
 0x2f1   : > { %1370 = vmatprep.subr.mxu0 %v1307_v23  ;;  %1447 = vmatprep.subr.mxu1 %v1309_v48  ;;  %v1294_v12 = vmax.f32 %v1045_v37, 0.0  ;;  %v1296_v13 = vmax.f32 %v1206_v45, 0.0  ;;  %v1029_v54 = vadd.f32 %v2424_v14, %v834_v59  ;;  %v1190_v16 = vadd.f32 %v2425_v15, %v834_v59  ;;  %v1347_v45 = vpop.permute.xlu0 %1346  ;;  %v1722_v15 = vld [vmem:[%s1901_s26 + $0x28] sm:$0xff] }
 0x2f2   : > { %1371 = vmatpush1.msra.mxu0 %v1306_v46  ;;  %1448 = vmatpush1.msra.mxu1 %v1308_v32  ;;  %v1291_v40 = vmax.f32 %v1041_v2, 0.0  ;;  %v1293_v55 = vmax.f32 %v1202_v42, 0.0  ;;  %v1027_v53 = vadd.f32 %v2426_v18, %v834_v59  ;;  %v1188_v20 = vadd.f32 %v2427_v19, %v834_v59 }
 0x2f3   : > { %1372 = vmatprep.subr.mxu0 %v1303_v31  ;;  %1449 = vmatprep.subr.mxu1 %v1305_v30  ;;  %v1290_v21 = vmax.f32 %v1039_v44, 0.0  ;;  %v1292_v50 = vmax.f32 %v1200_v6, 0.0  ;;  %v1023_v25 = vadd.f32 %v2428_v51, %v829_v52  ;;  %v1184_v8 = vadd.f32 %v2429_v24, %v829_v52  ;;  %v1717_v44 = vld [vmem:[%s1901_s26 + $0x10] sm:$0xff] }
 0x2f4   : > { %1373 = vmatpush1.msra.mxu0 %v1302_v36  ;;  %1450 = vmatpush1.msra.mxu1 %v1304_v39  ;;  %v1287_v23 = vmax.f32 %v1035_v63, 0.0  ;;  %v1289_v48 = vmax.f32 %v1196_v9, 0.0  ;;  %v1021_v28 = vadd.f32 %v2430_v49, %v829_v52  ;;  %v1182_v4 = vadd.f32 %v2431_v29, %v829_v52  ;;  %v1718_v63 = vld [vmem:[%s1901_s26 + $0x8] sm:$0xff]  ;;  %v1719_v9 = vld [vmem:[%s1901_s26 + $0x18] sm:$0xff] }
 0x2f5   : > { %1374 = vmatprep.subr.mxu0 %v1299_v43  ;;  %1451 = vmatprep.subr.mxu1 %v1301_v0  ;;  %v1286_v33 = vmax.f32 %v1033_v56, 0.0  ;;  %v1288_v46 = vmax.f32 %v1194_v57, 0.0  ;;  %v1283_v32 = vmax.f32 %v1029_v54, 0.0  ;;  %v1285_v7 = vmax.f32 %v1190_v16, 0.0  ;;  %v1352_v43 = vpop.permute.xlu1 %1351  ;;  %v1716_v0 = vld [vmem:[%s1901_s26] sm:$0xff] }
 0x2f6   : > { %1375 = vmatpush1.msra.mxu0 %v1298_v62  ;;  %1452 = vmatpush1.msra.mxu1 %v1300_v22  ;;  %v1282_v17 = vmax.f32 %v1027_v53, 0.0  ;;  %v1284_v27 = vmax.f32 %v1188_v20, 0.0  ;;  %v1279_v26 = vmax.f32 %v1023_v25, 0.0  ;;  %v1281_v31 = vmax.f32 %v1184_v8, 0.0 }
 0x2f7   : > { %1376 = vmatprep.subr.mxu0 %v1295_v58  ;;  %1453 = vmatprep.subr.mxu1 %v1297_v35  ;;  %v1278_v30 = vmax.f32 %v1021_v28, 0.0  ;;  %v1280_v38 = vmax.f32 %v1182_v4, 0.0  ;;  %v2432_v37 = vmov 0.0  }
 0x2f8   : > { %1377 = vmatpush1.msra.mxu0 %v1294_v12  ;;  %1454 = vmatpush1.msra.mxu1 %v1296_v13  ;;  %v1721_v12 = vld [vmem:[%s1901_s26 + $0x30] sm:$0xff] }
 0x2f9   : > { %1378 = vmatprep.subr.mxu0 %v1291_v40  ;;  %1455 = vmatprep.subr.mxu1 %v1293_v55  ;;  %v1723_v40 = vld [vmem:[%s1901_s26 + $0x38] sm:$0xff] }
 0x2fa   : > { %1379 = vmatpush1.msra.mxu0 %v1290_v21  ;;  %1456 = vmatpush1.msra.mxu1 %v1292_v50 }
 0x2fb   : > { %1380 = vmatprep.subr.mxu0 %v1287_v23  ;;  %1457 = vmatprep.subr.mxu1 %v1289_v48 }
 0x2fc   : > { %1381 = vmatpush1.msra.mxu0 %v1286_v33  ;;  %1458 = vmatpush1.msra.mxu1 %v1288_v46 }
 0x2fd   : > { %1382 = vmatprep.subr.mxu0 %v1283_v32  ;;  %1459 = vmatprep.subr.mxu1 %v1285_v7 }
 0x2fe   : > { %1383 = vmatpush1.msra.mxu0 %v1282_v17  ;;  %1460 = vmatpush1.msra.mxu1 %v1284_v27 }
 0x2ff   : > { %1384 = vmatprep.subr.mxu0 %v1279_v26  ;;  %1461 = vmatprep.subr.mxu1 %v1281_v31 }
 0x300   : > { %1385 = vmatpush1.msra.mxu0 %v1278_v30  ;;  %1462 = vmatpush1.msra.mxu1 %v1280_v38 }
 0x301   : > { %1419 = vmatmul.mubr.f32.vlgmr.msra.gmra.mxu0 %v1276_v34  ;;  %1496 = vmatmul.mubr.f32.vlgmr.msra.gmra.mxu1 %v1276_v34 }
 0x302   : > { %1424 = vmatprep.mubr.f32.mxu0 %v2432_v37  ;;  %1501 = vmatprep.mubr.f32.mxu1 %v2432_v37 }
 0x305   : > { %1425 = vmatmul.mubr.f32.gmra.mxu0 %v1277_v41  ;;  %1502 = vmatmul.mubr.f32.gmra.mxu1 %v1277_v41 }
 0x3c1   : > { %v1420_v36 = vpop.f32.mrf.mxu0  ;;  %v1497_v39 = vpop.f32.mrf.mxu1 }
 0x3c2   : > { %v1421_v47 = vadd.f32 %v1420_v36, %v1347_v45  ;;  %v1498_v2 = vadd.f32 %v1497_v39, %v1347_v45 }
 0x3c3   : > { %v1422_v5 = vpop.f32.mrf.mxu0  ;;  %v1499_v42 = vpop.f32.mrf.mxu1 }
 0x3c4   : > { %v1508_v3 = vadd.f32 %v1716_v0, %v1421_v47  ;;  %v1510_v1 = vadd.f32 %v1717_v44, %v1498_v2  ;;  %v1423_v6 = vadd.f32 %v1422_v5, %v1347_v45  ;;  %v1500_v62 = vadd.f32 %v1499_v42, %v1347_v45 }
 0x3c5   : > { %v1426_v22 = vpop.f32.mrf.mxu0  ;;  %v1503_v60 = vpop.f32.mrf.mxu1 }
 0x3c6   : > { %1516 = vst [vmem:[%s2300_s20] sm:$0xff] %v1508_v3  ;;  %1518 = vst [vmem:[%s2300_s20 + $0x10] sm:$0xff] %v1510_v1  ;;  %v1509_v61 = vadd.f32 %v1718_v63, %v1423_v6  ;;  %v1511_v58 = vadd.f32 %v1719_v9, %v1500_v62  ;;  %v1427_v35 = vadd.f32 %v1426_v22, %v1352_v43 }
 0x3c7   : > { %v1504_v59 = vadd.f32 %v1503_v60, %v1352_v43  ;;  %v1428_v10 = vpop.f32.mrf.mxu0  ;;  %v1505_v56 = vpop.f32.mrf.mxu1 }
 0x3c8   : > { %1517 = vst [vmem:[%s2300_s20 + $0x8] sm:$0xff] %v1509_v61  ;;  %1519 = vst [vmem:[%s2300_s20 + $0x18] sm:$0xff] %v1511_v58  ;;  %v1512_v57 = vadd.f32 %v1720_v11, %v1427_v35  ;;  %v1429_v14 = vadd.f32 %v1428_v10, %v1352_v43  ;;  %v1506_v54 = vadd.f32 %v1505_v56, %v1352_v43 }
 0x3c9   : > { %v1514_v13 = vadd.f32 %v1721_v12, %v1504_v59 }
 0x3ca   : > { %1520 = vst [vmem:[%s2300_s20 + $0x20] sm:$0xff] %v1512_v57  ;;  %v1513_v16 = vadd.f32 %v1722_v15, %v1429_v14  ;;  %v1515_v55 = vadd.f32 %v1723_v40, %v1506_v54 }
 0x3cb   : > { %1522 = vst [vmem:[%s2300_s20 + $0x30] sm:$0xff] %v1514_v13 }
 0x3cc   : > { %1521 = vst [vmem:[%s2300_s20 + $0x28] sm:$0xff] %v1513_v16  ;;  %1523 = vst [vmem:[%s2300_s20 + $0x38] sm:$0xff] %v1515_v55 }
 0x3cd   : > { %1737 = shalt.err (!%p1734_p5)
}
 0x3ce   : > { %s1738_s24 = scalar_lea.hbm %s2318_s23, 1024  ;;  %s1742_s20 = scalar_lea.hbm %s2377_s8, 2048 }
 0x3cf   : > { %p1739_p7 = scmp.ne.s32.totalorder %s2318_s23, %s1738_s24  ;;  %p1743_p12 = scmp.lt.s32.totalorder %s2318_s23, %s2377_s8 }
 0x3d0   : > { %p1744_p13 = scmp.lt.s32.totalorder %s1742_s20, %s1738_s24 }
 0x3d1   : > { %p1740_p10 = pnand %p1739_p7, %p1875_p6 }
 0x3d2   : > { %p1745_p0 = por %p1744_p13, %p1743_p12 }
 0x3d3   : > { %p1741_p11 = pneg %p1740_p10 }
 0x3d5   : > { %p1746_p1 = pnand %p1745_p0, %p1741_p11 }
 0x3d7   : > { %1749 = shalt.err (!%p1746_p1)
}
 0x3d8   : > { %s1789_s22 = smov 512   ;;  %s1790_s12 = smov 1024  }
 0x3d9   : > { %s1791_s13 = smov 32  }
 0x3da   : > { %1670 = dma.vmem_to_hbm [thread:$0]  (%p1875_p6), %s2309_s21, 1024, %s2318_s23, %s2328_s10, %s1789_s22, %s1790_s12, %s1791_s13  }
 0x3db PF: > { %s1553_s17 = sand.u32 1, %s1772_s27   ;;  %p1673_p2 = pnand %p1608_p9, %p1879_p8 }
 0x3dc   : > { %s1554_s18 = scalar_lea.sflag [#allocation4], %s1553_s17 }
 0x3dd   : > { %p1674_p3 = pneg %p1673_p2 }
 0x3df   : > { %1767 = dma.done.wait (%p1674_p3), %s1554_s18, 1024  }
 0x3e0   : > { %1769 = vsyncadd (%p1674_p3), %s1554_s18, 4294966272  ;;  %p18_p4 = scmp.ge.s32.totalorder %s1860_s11, 4   ;;  %s2433_s27 = smov %s1776_s28 }
 0x3e1   : > { %s2434_s28 = smov %s1780_s29  ;;  %s2435_s29 = smov %s1873_s14 }
 0x3e2   : > { %s2436_s30 = smov %s1860_s11  ;;  %20 = sbr.rel (!%p18_p4) target bundleno = 3 (0x3), region = 115 }
 0x3e7   :  { %1559 = vsyncpa [#allocation4], 1 }
 0x3e8   :  { %1561 = vsyncpa [#allocation4 + $0x1], 1 }

</bundles_post_ra>
